<compile_context>
chip_gen: v7x
topology: tpu7x:2x2x1
jax: 0.10.0
libtpu: 0.0.40
codegen_flags: <defaults>
</compile_context>

<pallas_src>
import functools

import jax
import jax.numpy as jnp
from jax.experimental import pallas as pl
from jax.experimental.pallas import tpu as pltpu


def _round_up(x: int, m: int) -> int:
    return ((x + m - 1) // m) * m


def _simple_fc_kernel(x_ref, w1_ref, b1_ref, w2_ref, b2_ref, o_ref):
    # x_ref : (TB, D_in_p)    bf16
    # w1_ref: (D_in_p, H)     bf16
    # b1_ref: (1, H)          f32
    # w2_ref: (H, D_out_p)    bf16
    # b2_ref: (1, D_out_p)    f32
    # o_ref : (TB, D_out_p)   f32
    # fc1 on the MXU (bf16 operands, f32 accumulation)
    h = jnp.dot(x_ref[...], w1_ref[...], preferred_element_type=jnp.float32)
    # bias + ReLU in f32 on the VPU
    h = jnp.maximum(h + b1_ref[...], 0.0)
    # fc2: cast activations to bf16 for the MXU, accumulate in f32
    y = jnp.dot(h.astype(jnp.bfloat16), w2_ref[...],
                preferred_element_type=jnp.float32)
    o_ref[...] = (y + b2_ref[...]).astype(o_ref.dtype)


@functools.partial(jax.jit, static_argnames=("block_b",))
def simple_fc_forward(x, w1, b1, w2, b2, *, block_b=128):
    """x: (B, C, H, W) float32 -> (B, D_out) float32."""
    batch = x.shape[0]
    x2d = x.reshape(batch, -1)
    d_in = x2d.shape[1]
    hidden = w1.shape[1]
    d_out = w2.shape[1]

    # Padded (lane-dense) dimensions.
    d_in_p = _round_up(d_in, 128)
    d_out_p = _round_up(d_out, 128)

    # Batch tile: small batches run as a single (8-row-aligned) block;
    # large batches tile at block_b rows per grid step.
    tb = min(block_b, _round_up(batch, 8))
    batch_p = _round_up(batch, tb)

    # bf16 matmul operands, zero-padded to lane-aligned shapes.
    x_p = jnp.zeros((batch_p, d_in_p), jnp.bfloat16)
    x_p = x_p.at[:batch, :d_in].set(x2d.astype(jnp.bfloat16))
    w1_p = jnp.zeros((d_in_p, hidden), jnp.bfloat16)
    w1_p = w1_p.at[:d_in, :].set(w1.astype(jnp.bfloat16))
    w2_p = jnp.zeros((hidden, d_out_p), jnp.bfloat16)
    w2_p = w2_p.at[:, :d_out].set(w2.astype(jnp.bfloat16))
    b1_p = b1.astype(jnp.float32).reshape(1, hidden)
    b2_p = jnp.zeros((1, d_out_p), jnp.float32)
    b2_p = b2_p.at[:, :d_out].set(b2.astype(jnp.float32).reshape(1, d_out))

    grid = (batch_p // tb,)
    out = pl.pallas_call(
        _simple_fc_kernel,
        out_shape=jax.ShapeDtypeStruct((batch_p, d_out_p), jnp.float32),
        grid=grid,
        in_specs=[
            pl.BlockSpec((tb, d_in_p), lambda i: (i, 0)),        # x tile
            pl.BlockSpec((d_in_p, hidden), lambda i: (0, 0)),    # w1 (resident)
            pl.BlockSpec((1, hidden), lambda i: (0, 0)),         # b1
            pl.BlockSpec((hidden, d_out_p), lambda i: (0, 0)),   # w2 (resident)
            pl.BlockSpec((1, d_out_p), lambda i: (0, 0)),        # b2
        ],
        out_specs=pl.BlockSpec((tb, d_out_p), lambda i: (i, 0)),
        compiler_params=pltpu.CompilerParams(
            dimension_semantics=("parallel",)),
    )(x_p, w1_p, b1_p, w2_p, b2_p)
    # TODO(synk): for much larger D_in/hidden, add a K-tiled reduction grid
    # (accumulator scratch + pl.when init) instead of whole-resident weights.
    return out[:batch, :d_out]


def init_params(key, input_size, hidden_size, output_size):
    """Deterministic init mimicking nn.Linear's U(-1/sqrt(fan_in), 1/sqrt(fan_in))."""
    k1, k2, k3, k4 = jax.random.split(key, 4)
    s1 = 1.0 / jnp.sqrt(input_size)
    s2 = 1.0 / jnp.sqrt(hidden_size)
    w1 = jax.random.uniform(k1, (input_size, hidden_size), jnp.float32, -s1, s1)
    b1 = jax.random.uniform(k2, (1, hidden_size), jnp.float32, -s1, s1)
    w2 = jax.random.uniform(k3, (hidden_size, output_size), jnp.float32, -s2, s2)
    b2 = jax.random.uniform(k4, (1, output_size), jnp.float32, -s2, s2)
    return w1, b1, w2, b2


if __name__ == "__main__":
    # MNIST-like small config: 1x28x28 images -> 784 -> 128 -> 10
    batch, channels, height, width = 8, 1, 28, 28
    input_size = channels * height * width
    hidden_size = 128
    output_size = 10

    key = jax.random.PRNGKey(0)
    kx, kp = jax.random.split(key)
    x = jax.random.normal(kx, (batch, channels, height, width), jnp.float32)
    w1, b1, w2, b2 = init_params(kp, input_size, hidden_size, output_size)

    out = simple_fc_forward(x, w1, b1, w2, b2)
    jax.block_until_ready(out)
    assert out.shape == (batch, output_size)

    # Reference following the same bf16-operand / f32-accumulate path.
    x2d = x.reshape(batch, -1)
    h_ref = jnp.maximum(
        jnp.dot(x2d.astype(jnp.bfloat16), w1.astype(jnp.bfloat16),
                preferred_element_type=jnp.float32) + b1, 0.0)
    ref_bf16 = jnp.dot(h_ref.astype(jnp.bfloat16), w2.astype(jnp.bfloat16),
                       preferred_element_type=jnp.float32) + b2
    assert jnp.allclose(out, ref_bf16, atol=1e-2, rtol=1e-2)

    # Coarser check against the full-f32 reference (bf16 operands add ~1e-2 rel error).
    ref_f32 = jnp.maximum(x2d @ w1 + b1, 0.0) @ w2 + b2
    assert jnp.allclose(out, ref_f32, atol=5e-2, rtol=5e-2)

    print("KERNEL_OK")
</pallas_src>

<mosaic_0001>
module attributes {stable_mosaic.version = 11 : i64} {
  func.func @_simple_fc_kernel(%arg0: i32, %arg1: memref<8x896xbf16, #tpu.memory_space<vmem>>, %arg2: memref<896x128xbf16, #tpu.memory_space<vmem>>, %arg3: memref<1x128xf32, #tpu.memory_space<vmem>>, %arg4: memref<128x128xbf16, #tpu.memory_space<vmem>>, %arg5: memref<1x128xf32, #tpu.memory_space<vmem>>, %arg6: memref<8x128xf32, #tpu.memory_space<vmem>>) attributes {dimension_semantics = [#tpu.dimension_semantics<parallel>], iteration_bounds = array<i64: 1>, scalar_prefetch = 0 : i64, scratch_operands = 0 : i64, tpu.core_type = #tpu.core_type<tc>, window_params = [{transform_indices = @transform_0, window_bounds = array<i64: 8, 896>}, {pipeline_mode = #tpu.pipeline_mode<synchronous>, transform_indices = @transform_1, window_bounds = array<i64: 896, 128>}, {pipeline_mode = #tpu.pipeline_mode<synchronous>, transform_indices = @transform_2, window_bounds = array<i64: 1, 128>}, {pipeline_mode = #tpu.pipeline_mode<synchronous>, transform_indices = @transform_3, window_bounds = array<i64: 128, 128>}, {pipeline_mode = #tpu.pipeline_mode<synchronous>, transform_indices = @transform_4, window_bounds = array<i64: 1, 128>}, {transform_indices = @transform_5, window_bounds = array<i64: 8, 128>}]} {
    %c0 = arith.constant 0 : index
    %c0_0 = arith.constant 0 : index
    %0 = vector.load %arg1[%c0, %c0_0] : memref<8x896xbf16, #tpu.memory_space<vmem>>, vector<8x896xbf16>
    %c0_1 = arith.constant 0 : index
    %c0_2 = arith.constant 0 : index
    %1 = vector.load %arg2[%c0_1, %c0_2] : memref<896x128xbf16, #tpu.memory_space<vmem>>, vector<896x128xbf16>
    %cst = arith.constant dense<0.000000e+00> : vector<8x128xf32>
    %2 = tpu.matmul %0, %1, %cst {dimension_numbers = #tpu.dot_dimension_numbers<[1], [0], [0], [1], [0, 0, 1, 1], [], []>} : vector<8x896xbf16>, vector<896x128xbf16>, vector<8x128xf32> -> vector<8x128xf32>
    %c0_3 = arith.constant 0 : index
    %c0_4 = arith.constant 0 : index
    %3 = vector.load %arg3[%c0_3, %c0_4] : memref<1x128xf32, #tpu.memory_space<vmem>>, vector<1x128xf32>
    %4 = vector.broadcast %3 : vector<1x128xf32> to vector<8x128xf32>
    %5 = arith.addf %2, %4 : vector<8x128xf32>
    %cst_5 = arith.constant 0.000000e+00 : f32
    %6 = vector.broadcast %cst_5 : f32 to vector<8x128xf32>
    %7 = arith.maximumf %5, %6 : vector<8x128xf32>
    %8 = arith.truncf %7 : vector<8x128xf32> to vector<8x128xbf16>
    %c0_6 = arith.constant 0 : index
    %c0_7 = arith.constant 0 : index
    %9 = vector.load %arg4[%c0_6, %c0_7] : memref<128x128xbf16, #tpu.memory_space<vmem>>, vector<128x128xbf16>
    %cst_8 = arith.constant dense<0.000000e+00> : vector<8x128xf32>
    %10 = tpu.matmul %8, %9, %cst_8 {dimension_numbers = #tpu.dot_dimension_numbers<[1], [0], [0], [1], [0, 0, 1, 1], [], []>} : vector<8x128xbf16>, vector<128x128xbf16>, vector<8x128xf32> -> vector<8x128xf32>
    %c0_9 = arith.constant 0 : index
    %c0_10 = arith.constant 0 : index
    %11 = vector.load %arg5[%c0_9, %c0_10] : memref<1x128xf32, #tpu.memory_space<vmem>>, vector<1x128xf32>
    %12 = vector.broadcast %11 : vector<1x128xf32> to vector<8x128xf32>
    %13 = arith.addf %10, %12 : vector<8x128xf32>
    %c0_11 = arith.constant 0 : index
    %c0_12 = arith.constant 0 : index
    %14 = vector.load %arg6[%c0_11, %c0_12] : memref<8x128xf32, #tpu.memory_space<vmem>>, vector<8x128xf32>
    tpu.vector_store %arg6[%c0_11, %c0_12], %13 {strides = array<i32>} : memref<8x128xf32, #tpu.memory_space<vmem>>, vector<8x128xf32>,
    return
  }
  func.func @transform_0(%arg0: i32) -> (i32, i32) {
    %c0_i32 = arith.constant 0 : i32
    %c0_i32_0 = arith.constant 0 : i32
    return %arg0, %c0_i32 : i32, i32
  }
  func.func @transform_1(%arg0: i32) -> (i32, i32) {
    %c0_i32 = arith.constant 0 : i32
    %c0_i32_0 = arith.constant 0 : i32
    %c0_i32_1 = arith.constant 0 : i32
    return %c0_i32, %c0_i32_0 : i32, i32
  }
  func.func @transform_2(%arg0: i32) -> (i32, i32) {
    %c0_i32 = arith.constant 0 : i32
    %c0_i32_0 = arith.constant 0 : i32
    %c0_i32_1 = arith.constant 0 : i32
    return %c0_i32, %c0_i32_0 : i32, i32
  }
  func.func @transform_3(%arg0: i32) -> (i32, i32) {
    %c0_i32 = arith.constant 0 : i32
    %c0_i32_0 = arith.constant 0 : i32
    %c0_i32_1 = arith.constant 0 : i32
    return %c0_i32, %c0_i32_0 : i32, i32
  }
  func.func @transform_4(%arg0: i32) -> (i32, i32) {
    %c0_i32 = arith.constant 0 : i32
    %c0_i32_0 = arith.constant 0 : i32
    %c0_i32_1 = arith.constant 0 : i32
    return %c0_i32, %c0_i32_0 : i32, i32
  }
  func.func @transform_5(%arg0: i32) -> (i32, i32) {
    %c0_i32 = arith.constant 0 : i32
    %c0_i32_0 = arith.constant 0 : i32
    return %arg0, %c0_i32 : i32, i32
  }
}

</mosaic_0001>

<bundles_post_ra>
// kernel: simple_fc_forward.1
= control target key start
LH: loop header
LB: loop body
LE: loop exit
PB: predicated region body
PF: predicated region fallthrough
CT: control target
= control target key end

     0   :  { %v1089_v42 = vmov 0.0   ;;  %vm1090_vm0 = vmmov 0   ;;  %s1364_s0 = inlined_call_operand.vmem [shape: bf16[8,896], index: 0, kind: input, shape index: {}]   ;;  %s1365_s1 = inlined_call_operand.vmem [shape: bf16[896,128], index: 1, kind: input, shape index: {}]   ;;  %s1366_s2 = inlined_call_operand.vmem [shape: f32[1,128], index: 2, kind: input, shape index: {}]   ;;  %s1367_s3 = inlined_call_operand.vmem [shape: bf16[128,128], index: 3, kind: input, shape index: {}]   ;;  %s1368_s4 = inlined_call_operand.vmem [shape: f32[1,128], index: 4, kind: input, shape index: {}]   ;;  %s1369_s5 = inlined_call_operand.hbm [shape: f32[8,128], index: 5, kind: output, shape index: {}]  }
   0x1   :  { %v994_v0 = vld [vmem:[%s1365_s1 + $0x40] sm:$0xff]   ;;  %v998_v4 = vld [vmem:[%s1365_s1 + $0x48] sm:$0xff]   ;;  %v1002_v8 = vld [vmem:[%s1365_s1 + $0x50] sm:$0xff]  }
   0x2   :  { %v995_v1 = vld [vmem:[%s1365_s1] sm:$0xff]   ;;  %867 = vmatprep.subr.bf16.mxu0 %v994_v0  ;;  %v999_v5 = vld [vmem:[%s1365_s1 + $0x8] sm:$0xff]   ;;  %v1003_v9 = vld [vmem:[%s1365_s1 + $0x10] sm:$0xff]  }
   0x3   :  { %v996_v2 = vld [vmem:[%s1365_s1 + $0xc0] sm:$0xff]   ;;  %868 = vmatpush3.bf16.msra.mxu0 %v995_v1  ;;  %v1000_v6 = vld [vmem:[%s1365_s1 + $0xc8] sm:$0xff]   ;;  %v1004_v10 = vld [vmem:[%s1365_s1 + $0xd0] sm:$0xff]  }
   0x4   :  { %v997_v3 = vld [vmem:[%s1365_s1 + $0x80] sm:$0xff]   ;;  %889 = vmatprep.subr.bf16.mxu1 %v996_v2  ;;  %869 = vmatprep.subr.bf16.mxu0 %v998_v4  ;;  %v1001_v7 = vld [vmem:[%s1365_s1 + $0x88] sm:$0xff]   ;;  %v1005_v11 = vld [vmem:[%s1365_s1 + $0x90] sm:$0xff]  }
   0x5   :  { %890 = vmatpush3.bf16.msra.mxu1 %v997_v3  ;;  %v1006_v12 = vld [vmem:[%s1365_s1 + $0x58] sm:$0xff]   ;;  %v1010_v16 = vld [vmem:[%s1365_s1 + $0x60] sm:$0xff]   ;;  %v1014_v20 = vld [vmem:[%s1365_s1 + $0x68] sm:$0xff]  }
   0x6   :  { %891 = vmatprep.subr.bf16.mxu1 %v1000_v6  ;;  %v1007_v13 = vld [vmem:[%s1365_s1 + $0x18] sm:$0xff]   ;;  %v1011_v17 = vld [vmem:[%s1365_s1 + $0x20] sm:$0xff]   ;;  %v1015_v21 = vld [vmem:[%s1365_s1 + $0x28] sm:$0xff]  }
   0x7   :  { %870 = vmatpush3.bf16.msra.mxu0 %v999_v5  ;;  %v1008_v14 = vld [vmem:[%s1365_s1 + $0xd8] sm:$0xff]   ;;  %v1012_v18 = vld [vmem:[%s1365_s1 + $0xe0] sm:$0xff]   ;;  %v1016_v22 = vld [vmem:[%s1365_s1 + $0xe8] sm:$0xff]  }
   0x8   :  { %871 = vmatprep.subr.bf16.mxu0 %v1002_v8  ;;  %v1009_v15 = vld [vmem:[%s1365_s1 + $0x98] sm:$0xff]   ;;  %v1013_v19 = vld [vmem:[%s1365_s1 + $0xa0] sm:$0xff]   ;;  %v1017_v23 = vld [vmem:[%s1365_s1 + $0xa8] sm:$0xff]  }
   0x9   :  { %892 = vmatpush3.bf16.msra.mxu1 %v1001_v7  ;;  %v1018_v24 = vld [vmem:[%s1365_s1 + $0x70] sm:$0xff]   ;;  %v1022_v28 = vld [vmem:[%s1365_s1 + $0x78] sm:$0xff]   ;;  %v22_v31 = vld [vmem:[%s1364_s0] sm:$0xff] }
   0xa   :  { %893 = vmatprep.subr.bf16.mxu1 %v1004_v10  ;;  %v1019_v25 = vld [vmem:[%s1365_s1 + $0x30] sm:$0xff]   ;;  %v1023_v29 = vld [vmem:[%s1365_s1 + $0x38] sm:$0xff]   ;;  %v795_v32 = vcombine.low %v22_v31, %v22_v31  ;;  %v796_v33 = vcombine.high %v22_v31, %v22_v31  ;;  %v1028_v35 = vld [vmem:[%s1365_s1 + $0x140] sm:$0xff]  }
   0xb   :  { %872 = vmatpush3.bf16.msra.mxu0 %v1003_v9  ;;  %v1020_v26 = vld [vmem:[%s1365_s1 + $0xf0] sm:$0xff]   ;;  %v1024_v30 = vld [vmem:[%s1365_s1 + $0xf8] sm:$0xff]   ;;  %v23_v36 = vld [vmem:[%s1364_s0 + $0x8] sm:$0xff] }
   0xc   :  { %873 = vmatprep.subr.bf16.mxu0 %v1006_v12  ;;  %v1021_v27 = vld [vmem:[%s1365_s1 + $0xb0] sm:$0xff]   ;;  %v1027_v34 = vld [vmem:[%s1365_s1 + $0xb8] sm:$0xff]   ;;  %538 = vmatprep.mubr.bf16.mxu0 %v796_v33  ;;  %v797_v37 = vcombine.low %v23_v36, %v23_v36  ;;  %v798_v38 = vcombine.high %v23_v36, %v23_v36  ;;  %v1031_v39 = vld [vmem:[%s1365_s1 + $0x100] sm:$0xff]  }
   0xd   :  { %894 = vmatpush3.bf16.msra.mxu1 %v1005_v11  ;;  %v1032_v40 = vld [vmem:[%s1365_s1 + $0x180] sm:$0xff]   ;;  %v1033_v41 = vld [vmem:[%s1365_s1 + $0x148] sm:$0xff]   ;;  %v1036_v45 = vld [vmem:[%s1365_s1 + $0x150] sm:$0xff]  }
   0xe   :  { %895 = vmatprep.subr.bf16.mxu1 %v1008_v14  ;;  %578 = vmatprep.mubr.bf16.mxu1 %v798_v38  ;;  %v1034_v43 = vld [vmem:[%s1365_s1 + $0x108] sm:$0xff]   ;;  %v1037_v46 = vld [vmem:[%s1365_s1 + $0x110] sm:$0xff]   ;;  %v1039_v48 = vld [vmem:[%s1365_s1 + $0x158] sm:$0xff]  }
   0xf   :  { %874 = vmatpush3.bf16.msra.mxu0 %v1007_v13  ;;  %v1035_v44 = vld [vmem:[%s1365_s1 + $0x188] sm:$0xff]   ;;  %v1038_v47 = vld [vmem:[%s1365_s1 + $0x190] sm:$0xff]   ;;  %v1040_v49 = vld [vmem:[%s1365_s1 + $0x118] sm:$0xff]  }
  0x10   :  { %875 = vmatprep.subr.bf16.mxu0 %v1010_v16  ;;  %v1042_v50 = vld [vmem:[%s1365_s1 + $0x160] sm:$0xff]   ;;  %v1041_v51 = vld [vmem:[%s1365_s1 + $0x198] sm:$0xff]   ;;  %v1045_v53 = vld [vmem:[%s1365_s1 + $0x168] sm:$0xff]  }
  0x11   :  { %896 = vmatpush3.bf16.msra.mxu1 %v1009_v15  ;;  %v1043_v52 = vld [vmem:[%s1365_s1 + $0x120] sm:$0xff]   ;;  %v1046_v55 = vld [vmem:[%s1365_s1 + $0x128] sm:$0xff]   ;;  %v1048_v56 = vld [vmem:[%s1365_s1 + $0x170] sm:$0xff]  }
  0x12   :  { %897 = vmatprep.subr.bf16.mxu1 %v1012_v18  ;;  %v1044_v54 = vld [vmem:[%s1365_s1 + $0x1a0] sm:$0xff]   ;;  %v1047_v57 = vld [vmem:[%s1365_s1 + $0x1a8] sm:$0xff]   ;;  %v1049_v58 = vld [vmem:[%s1365_s1 + $0x130] sm:$0xff]  }
  0x13   :  { %876 = vmatpush3.bf16.msra.mxu0 %v1011_v17  ;;  %v24_v59 = vld [vmem:[%s1364_s0 + $0x10] sm:$0xff]  ;;  %v1051_v62 = vld [vmem:[%s1365_s1 + $0x178] sm:$0xff]  }
  0x14   :  { %877 = vmatprep.subr.bf16.mxu0 %v1014_v20  ;;  %v1050_v60 = vld [vmem:[%s1365_s1 + $0x1b0] sm:$0xff]   ;;  %v800_v61 = vcombine.high %v24_v59, %v24_v59  ;;  %v1052_v63 = vld [vmem:[%s1365_s1 + $0x138] sm:$0xff]   ;;  %v799_v1 = vcombine.low %v24_v59, %v24_v59 }
  0x15   :  { %898 = vmatpush3.bf16.msra.mxu1 %v1013_v19  ;;  %v1055_v0 = vld [vmem:[%s1365_s1 + $0x1b8] sm:$0xff]  }
  0x16   :  { %899 = vmatprep.subr.bf16.mxu1 %v1016_v22 }
  0x17   :  { %878 = vmatpush3.bf16.msra.mxu0 %v1015_v21 }
  0x18   :  { %879 = vmatprep.subr.bf16.mxu0 %v1018_v24 }
  0x19   :  { %900 = vmatpush3.bf16.msra.mxu1 %v1017_v23 }
  0x1a   :  { %901 = vmatprep.subr.bf16.mxu1 %v1020_v26 }
  0x1b   :  { %880 = vmatpush3.bf16.msra.mxu0 %v1019_v25 }
  0x1c   :  { %881 = vmatprep.subr.bf16.mxu0 %v1022_v28 }
  0x1d   :  { %902 = vmatpush3.bf16.msra.mxu1 %v1021_v27 }
  0x1e   :  { %903 = vmatprep.subr.bf16.mxu1 %v1024_v30 }
  0x1f   :  { %882 = vmatpush3.bf16.msra.mxu0 %v1023_v29 }
  0x20   :  { %911 = vmatprep.subr.bf16.mxu0 %v1028_v35 }
  0x21   :  { %904 = vmatpush3.bf16.msra.mxu1 %v1027_v34 }
  0x22   :  { %539 = vmatmul.mubr.bf16.vlgmr.msra.gmra.mrb[0].mxu0 %v795_v32  ;;  %951 = vmatprep.subr.bf16.mxu1 %v1089_v42 }
  0x23   :  { %912 = vmatpush3.bf16.msra.mxu0 %v1031_v39  ;;  %618 = vmatprep.mubr.bf16.mxu0 %v800_v61 }
  0x24   :  { %579 = vmatmul.mubr.bf16.vlgmr.msra.gmra.mrb[0].mxu1 %v797_v37  ;;  %913 = vmatprep.subr.bf16.mxu0 %v1033_v41 }
  0x25   :  { %952 = vmatpush3.bf16.msra.mxu1 %v1032_v40  ;;  %967 = vmatprep.mubr.msk.bf16.mxu1 %vm1090_vm0, %v1089_v42 }
  0x26   :  { %953 = vmatprep.subr.bf16.mxu1 %v1089_v42 }
  0x27   :  { %914 = vmatpush3.bf16.msra.mxu0 %v1034_v43 }
  0x28   :  { %915 = vmatprep.subr.bf16.mxu0 %v1036_v45 }
  0x29   :  { %954 = vmatpush3.bf16.msra.mxu1 %v1035_v44 }
  0x2a   :  { %955 = vmatprep.subr.bf16.mxu1 %v1089_v42 }
  0x2b   :  { %916 = vmatpush3.bf16.msra.mxu0 %v1037_v46 }
  0x2c   :  { %917 = vmatprep.subr.bf16.mxu0 %v1039_v48 }
  0x2d   :  { %956 = vmatpush3.bf16.msra.mxu1 %v1038_v47 }
  0x2e   :  { %957 = vmatprep.subr.bf16.mxu1 %v1089_v42 }
  0x2f   :  { %918 = vmatpush3.bf16.msra.mxu0 %v1040_v49 }
  0x30   :  { %919 = vmatprep.subr.bf16.mxu0 %v1042_v50 }
  0x31   :  { %958 = vmatpush3.bf16.msra.mxu1 %v1041_v51 }
  0x32   :  { %959 = vmatprep.subr.bf16.mxu1 %v1089_v42 }
  0x33   :  { %920 = vmatpush3.bf16.msra.mxu0 %v1043_v52 }
  0x34   :  { %921 = vmatprep.subr.bf16.mxu0 %v1045_v53 }
  0x35   :  { %960 = vmatpush3.bf16.msra.mxu1 %v1044_v54 }
  0x36   :  { %961 = vmatprep.subr.bf16.mxu1 %v1089_v42 }
  0x37   :  { %922 = vmatpush3.bf16.msra.mxu0 %v1046_v55 }
  0x38   :  { %923 = vmatprep.subr.bf16.mxu0 %v1048_v56 }
  0x39   :  { %962 = vmatpush3.bf16.msra.mxu1 %v1047_v57 }
  0x3a   :  { %963 = vmatprep.subr.bf16.mxu1 %v1089_v42 }
  0x3b   :  { %924 = vmatpush3.bf16.msra.mxu0 %v1049_v58 }
  0x3c   :  { %925 = vmatprep.subr.bf16.mxu0 %v1051_v62 }
  0x3d   :  { %964 = vmatpush3.bf16.msra.mxu1 %v1050_v60 }
  0x3e   :  { %965 = vmatprep.subr.bf16.mxu1 %v1089_v42 }
  0x3f   :  { %10 = vsyncpa [#allocation3], 0  ;;  %926 = vmatpush3.bf16.msra.mxu0 %v1052_v63  ;;  %v1056_v2 = vld [vmem:[%s1364_s0 + $0x18] ss:$0 sps:$4 sm:$0xff]   ;;  %v1057_v3 = vld [vmem:[%s1367_s3] sm:$0xff]   ;;  %s1091_s29 = smov [#allocation2]  }
  0x40   :  { %971 = vmatprep.subr.bf16.mxu0 %v1089_v42  ;;  %v1058_v4 = vld [vmem:[%s1367_s3 + $0x8] sm:$0xff]   ;;  %v1059_v5 = vld [vmem:[%s1367_s3 + $0x10] sm:$0xff]   ;;  %v1060_v6 = vld [vmem:[%s1367_s3 + $0x18] sm:$0xff]   ;;  %s786_s30 = sshll.u32 %s1091_s29, 4  ;;  %s787_s30 = int_to_ptr.vmem [resolvable:$true] %s786_s30 }
  0x41   :  { %966 = vmatpush3.bf16.msra.mxu1 %v1055_v0  ;;  %v1061_v7 = vld [vmem:[%s1367_s3 + $0x20] sm:$0xff]   ;;  %v1062_v8 = vld [vmem:[%s1367_s3 + $0x28] sm:$0xff]   ;;  %v1063_v9 = vld [vmem:[%s1367_s3 + $0x30] sm:$0xff]   ;;  %s1065_s6 = scalar_lea.vmem %s787_s30, 128  ;;  %p1070_p1 = scmp.lt.s32.totalorder %s787_s30, %s787_s30 }
  0x42   :  { %619 = vmatmul.mubr.bf16.vlgmr.msra.gmra.mrb[4].mxu0 %v799_v1  ;;  %v1064_v10 = vld [vmem:[%s1367_s3 + $0x38] sm:$0xff]   ;;  %v794_v12 = vld [vmem:[%s1366_s2] ss:$0 sm:$0xff]  ;;  %p1066_p0 = scmp.ne.s32.totalorder %s787_s30, %s1065_s6  ;;  %p1071_p2 = scmp.lt.s32.totalorder %s1065_s6, %s1065_s6 }
  0x43   :  { %987 = vmatprep.mubr.msk.bf16.mxu0 %vm1090_vm0, %v1089_v42  ;;  %972 = vmatpush3.bf16.msra.mxu0 %v1057_v3  ;;  %v858_v37 = vld [vmem:[%s1368_s4] ss:$0 sm:$0xff] }
  0x44   :  { %968 = vmatmul.mubr.bf16.vlgmr.msra.gmra.mrb[4].mxu1 %v1056_v2  ;;  %973 = vmatprep.subr.bf16.mxu0 %v1089_v42  ;;  %p1072_p3 = por %p1071_p2, %p1070_p1 }
  0x46   :  { %p1073_p4 = pnand %p1072_p3, %p1066_p0 }
  0x47   :  { %974 = vmatpush3.bf16.msra.mxu0 %v1058_v4 }
  0x48   :  { %975 = vmatprep.subr.bf16.mxu0 %v1089_v42 }
  0x4b   :  { %976 = vmatpush3.bf16.msra.mxu0 %v1059_v5 }
  0x4c   :  { %977 = vmatprep.subr.bf16.mxu0 %v1089_v42 }
  0x4f   :  { %978 = vmatpush3.bf16.msra.mxu0 %v1060_v6 }
  0x50   :  { %979 = vmatprep.subr.bf16.mxu0 %v1089_v42 }
  0x53   :  { %980 = vmatpush3.bf16.msra.mxu0 %v1061_v7 }
  0x54   :  { %981 = vmatprep.subr.bf16.mxu0 %v1089_v42 }
  0x57   :  { %982 = vmatpush3.bf16.msra.mxu0 %v1062_v8 }
  0x58   :  { %983 = vmatprep.subr.bf16.mxu0 %v1089_v42 }
  0x5b   :  { %984 = vmatpush3.bf16.msra.mxu0 %v1063_v9 }
  0x5c   :  { %985 = vmatprep.subr.bf16.mxu0 %v1089_v42 }
  0x5f   :  { %986 = vmatpush3.bf16.msra.mxu0 %v1064_v10 }
  0xf5   :  { %v883_v11 = vpop.f32.mrb[0].mxu0 }
  0xf6   :  { %v884_v13 = vpop.f32.mrb[1].mxu0 }
  0xf7   :  { %v885_v14 = vadd.f32 %v884_v13, %v883_v11  ;;  %v886_v15 = vpop.f32.mrb[2].mxu0  ;;  %v905_v16 = vpop.f32.mrb[0].mxu1 }
  0xf8   :  { %v887_v17 = vpop.f32.mrb[3].mxu0  ;;  %v906_v18 = vpop.f32.mrb[1].mxu1 }
  0xf9   :  { %v541_v19 = vadd.f32 %v885_v14, %v794_v12  ;;  %v907_v20 = vadd.f32 %v906_v18, %v905_v16  ;;  %v908_v21 = vpop.f32.mrb[2].mxu1 }
  0xfa   :  { %v909_v22 = vpop.f32.mrb[3].mxu1 }
  0xfb   :  { %v581_v23 = vadd.f32 %v907_v20, %v541_v19 }
 0x115   :  { %v927_v24 = vpop.f32.mrb[4].mxu0 }
 0x116   :  { %v928_v25 = vpop.f32.mrb[5].mxu0 }
 0x117   :  { %v929_v26 = vadd.f32 %v928_v25, %v927_v24  ;;  %v930_v27 = vpop.f32.mrb[6].mxu0  ;;  %v660_v28 = vpop.f32.mrb[4].mxu1 }
 0x118   :  { %v931_v29 = vpop.f32.mrb[7].mxu0  ;;  %v969_v30 = vpop.f32.mrb[5].mxu1 }
 0x119   :  { %v621_v31 = vadd.f32 %v929_v26, %v581_v23  ;;  %v663_v32 = vpop.f32.mrb[6].mxu1 }
 0x11a   :  { %v970_v33 = vpop.f32.mrb[7].mxu1 }
 0x11b   :  { %v661_v34 = vadd.f32 %v660_v28, %v621_v31 }
 0x11d   :  { %v666_v35 = vmax.f32 %v661_v34, 0.0 }
 0x11f   :  { %v667_v36 = vpack.c.bf16 %v666_v35, %v666_v35 }
 0x121   :  { %988 = vmatmul.mubr.bf16.vlgmr.msra.gmra.mrb[8].mxu0 %v667_v36 }
 0x1f4   :  { %v773_v38 = vpop.f32.mrb[8].mxu0 }
 0x1f5   :  { %v774_v39 = vadd.f32 %v858_v37, %v773_v38  ;;  %v989_v40 = vpop.f32.mrb[9].mxu0 }
 0x1f6   :  { %v776_v41 = vpop.f32.mrb[10].mxu0 }
 0x1f7   :  { %779 = vst [vmem:[#allocation2] sm:$0xff] %v774_v39  ;;  %v990_v42 = vpop.f32.mrb[11].mxu0 }
 0x1f8   :  { %1076 = shalt.err (!%p1073_p4)
}
 0x1f9   :  { %s1077_s4 = scalar_lea.hbm %s1369_s5, 128 }
 0x1fa   :  { %p1078_p5 = scmp.ne.s32.totalorder %s1369_s5, %s1077_s4  ;;  %p1081_p6 = scmp.lt.u32.totalorder %s1077_s4, %s1369_s5 }
 0x1fc   :  { %p1083_p7 = pnand %p1081_p6, %p1078_p5 }
 0x1fe   :  { %1086 = shalt.err (!%p1083_p7)
}
 0x1ff   :  { %789 = dma.vmem_to_hbm [thread:$0]  %s787_s30, 128, %s1369_s5, [#allocation3]  }
 0x200   :  { %1087 = dma.done.wait [#allocation3], 128  }
 0x201   :  { %1088 = vsyncadd [#allocation3], 4294967168 }
 0x202   :  { %793 = vsyncpa [#allocation3], 1 }

</bundles_post_ra>
